<compile_context>
chip_gen: v6e
topology: v6e:2x2x1
jax: 0.10.0
libtpu: 0.0.40
codegen_flags: <defaults>
</compile_context>

<pallas_src>
import functools

import jax
import jax.numpy as jnp
from jax import lax
from jax.experimental import pallas as pl
from jax.experimental.pallas import tpu as pltpu


# Scoped-VMEM ceiling: leaves headroom under v7x's 64 MiB physical VMEM and is
# well above the 16/32 MiB defaults on v5e/v6e that would otherwise gate tiles.
_VMEM_LIMIT_BYTES = 48 * 1024 * 1024


def _cond_layer_norm_kernel(x_ref, w_ref, b_ref, o_ref, *, eps):
    # x_ref: (ts, H) tile of inputs; w_ref/b_ref: (1, H) per-batch scale/shift.
    x = x_ref[...].astype(jnp.float32)                      # (ts, H)
    mean = jnp.mean(x, axis=-1, keepdims=True)              # (ts, 1)  XLU reduce
    xc = x - mean
    var = jnp.mean(xc * xc, axis=-1, keepdims=True)         # (ts, 1)
    inv_std = lax.rsqrt(var + eps)                          # EUP rsqrt, no divide

    w = w_ref[...].astype(jnp.float32)                      # (1, H)
    b = b_ref[...].astype(jnp.float32)                      # (1, H)
    o_ref[...] = (xc * inv_std * w + b).astype(o_ref.dtype)


def _choose_seq_tile(B, S, H, io_dtype):
    """Pick the seq tile so the VMEM working set fits and the grid pipelines."""
    io_bytes = jnp.dtype(io_dtype).itemsize
    # Per seq-row: double-buffered input + double-buffered output tile in the
    # I/O dtype, plus ~3 live f32 (ts, H) intermediates (x, xc, result).
    bytes_per_row = 4 * H * io_bytes + 3 * H * 4
    budget = int(_VMEM_LIMIT_BYTES * 0.8)                   # headroom for misc
    ts = max(8, budget // max(bytes_per_row, 1))
    ts = min(ts, 1024)
    # Enough total grid steps (~8) for DMA pipelining / 2-TC load balance.
    target_steps = 8
    min_tiles_per_batch = max(1, -(-target_steps // max(B, 1)))
    ts = min(ts, -(-S // min_tiles_per_batch))
    # Sublane-align (multiples of 8), never exceed S.
    ts = max(8, (ts // 8) * 8)
    ts = min(ts, S)
    return ts


def conditional_layer_norm(inputs, cond, weight, bias, wd, bd, *, eps=1e-12):
    """inputs: [B, S, H], cond: [B, C], weight/bias: [H],
    wd/bd: [H, C] (PyTorch nn.Linear weight layout, bias=False). Returns [B, S, H]."""
    B, S, H = inputs.shape

    # Hoisted per-batch conditional scale/shift (tiny GEMM, amortized over S).
    c32 = cond.astype(jnp.float32)
    w_eff = (c32 @ wd.T.astype(jnp.float32)
             + weight.astype(jnp.float32)).reshape(B, 1, H)   # [B, 1, H]
    b_eff = (c32 @ bd.T.astype(jnp.float32)
             + bias.astype(jnp.float32)).reshape(B, 1, H)     # [B, 1, H]

    ts = _choose_seq_tile(B, S, H, inputs.dtype)
    grid = (B, pl.cdiv(S, ts))

    # TODO(synk): for deployed H that is not a multiple of 128, pad H (with
    # masked stats) in the wrapper to keep output stores lane-dense.

    itemsize = jnp.dtype(inputs.dtype).itemsize
    cost = pl.CostEstimate(
        flops=8 * B * S * H,
        transcendentals=B * S,
        bytes_accessed=2 * B * S * H * itemsize + 2 * B * H * 4,
    )

    kernel = functools.partial(_cond_layer_norm_kernel, eps=float(eps))

    return pl.pallas_call(
        kernel,
        out_shape=jax.ShapeDtypeStruct((B, S, H), inputs.dtype),
        grid=grid,
        in_specs=[
            # inputs tile: kernel sees (ts, H)
            pl.BlockSpec((pl.Squeezed(), ts, H), lambda b, s: (b, s, 0)),
            # per-batch scale/shift: kernel sees (1, H)
            pl.BlockSpec((pl.Squeezed(), 1, H), lambda b, s: (b, 0, 0)),
            pl.BlockSpec((pl.Squeezed(), 1, H), lambda b, s: (b, 0, 0)),
        ],
        out_specs=pl.BlockSpec((pl.Squeezed(), ts, H), lambda b, s: (b, s, 0)),
        compiler_params=pltpu.CompilerParams(
            dimension_semantics=("parallel", "parallel"),
            vmem_limit_bytes=_VMEM_LIMIT_BYTES,
        ),
        cost_estimate=cost,
    )(inputs, w_eff, b_eff)


def conditional_layer_norm_ref(inputs, cond, weight, bias, wd, bd, eps=1e-12):
    """Pure-JAX reference mirroring the PyTorch forward exactly."""
    x = inputs.astype(jnp.float32)
    c = cond.astype(jnp.float32)
    w = c @ wd.T.astype(jnp.float32) + weight.astype(jnp.float32)   # [B, H]
    b = c @ bd.T.astype(jnp.float32) + bias.astype(jnp.float32)     # [B, H]
    mean = jnp.mean(x, axis=-1, keepdims=True)
    xc = x - mean
    var = jnp.mean(xc * xc, axis=-1, keepdims=True)
    std = jnp.sqrt(var + eps)
    y = xc / std
    y = y * w[:, None, :] + b[:, None, :]
    return y.astype(inputs.dtype)


if __name__ == "__main__":
    key = jax.random.PRNGKey(0)
    k1, k2, k3, k4, k5, k6 = jax.random.split(key, 6)

    B, S, H, C = 2, 8, 32, 16   # batch, seq, normalized_shape (hidden), cond_shape

    inputs = jax.random.normal(k1, (B, S, H), dtype=jnp.float32)
    cond = jax.random.normal(k2, (B, C), dtype=jnp.float32)
    # Random (non-default-init) parameters so the conditional path is exercised.
    weight = 1.0 + 0.1 * jax.random.normal(k3, (H,), dtype=jnp.float32)
    bias = 0.1 * jax.random.normal(k4, (H,), dtype=jnp.float32)
    wd = 0.1 * jax.random.normal(k5, (H, C), dtype=jnp.float32)   # weight_dense.weight
    bd = 0.1 * jax.random.normal(k6, (H, C), dtype=jnp.float32)   # bias_dense.weight

    out = conditional_layer_norm(inputs, cond, weight, bias, wd, bd)
    out = jax.block_until_ready(out)
    ref = conditional_layer_norm_ref(inputs, cond, weight, bias, wd, bd)
    assert out.shape == (B, S, H)
    assert jnp.allclose(out, ref, rtol=1e-5, atol=1e-5), (
        float(jnp.max(jnp.abs(out - ref))))

    # Second check: longer sequence -> multiple seq tiles incl. a partial tile.
    S2 = 20
    k7, k8 = jax.random.split(k1)
    inputs2 = jax.random.normal(k7, (B, S2, H), dtype=jnp.float32)
    out2 = conditional_layer_norm(inputs2, cond, weight, bias, wd, bd)
    out2 = jax.block_until_ready(out2)
    ref2 = conditional_layer_norm_ref(inputs2, cond, weight, bias, wd, bd)
    assert jnp.allclose(out2, ref2, rtol=1e-5, atol=1e-5), (
        float(jnp.max(jnp.abs(out2 - ref2))))

    print("KERNEL_OK")
</pallas_src>

<mosaic_0001>
module attributes {stable_mosaic.version = 11 : i64} {
  func.func @_cond_layer_norm_kernel(%arg0: i32, %arg1: i32, %arg2: memref<1x8x32xf32, #tpu.memory_space<vmem>>, %arg3: memref<1x1x32xf32, #tpu.memory_space<vmem>>, %arg4: memref<1x1x32xf32, #tpu.memory_space<vmem>>, %arg5: memref<1x8x32xf32, #tpu.memory_space<vmem>>) attributes {dimension_semantics = [#tpu.dimension_semantics<parallel>, #tpu.dimension_semantics<parallel>], iteration_bounds = array<i64: 2, 1>, scalar_prefetch = 0 : i64, scratch_operands = 0 : i64, tpu.core_type = #tpu.core_type<tc>, window_params = [{transform_indices = @transform_0, window_bounds = array<i64: 1, 8, 32>}, {transform_indices = @transform_1, window_bounds = array<i64: 1, 1, 32>}, {transform_indices = @transform_2, window_bounds = array<i64: 1, 1, 32>}, {transform_indices = @transform_3, window_bounds = array<i64: 1, 8, 32>}]} {
    %c0 = arith.constant 0 : index
    %c0_0 = arith.constant 0 : index
    %c0_1 = arith.constant 0 : index
    %0 = vector.load %arg2[%c0, %c0_0, %c0_1] : memref<1x8x32xf32, #tpu.memory_space<vmem>>, vector<1x8x32xf32>
    %1 = vector.shape_cast %0 : vector<1x8x32xf32> to vector<8x32xf32>
    %cst = arith.constant dense<0.000000e+00> : vector<8xf32>
    %2 = vector.multi_reduction <add>, %1, %cst [1] : vector<8x32xf32> to vector<8xf32>
    %3 = vector.shape_cast %2 : vector<8xf32> to vector<8x1xf32>
    %cst_2 = arith.constant 3.200000e+01 : f32
    %4 = vector.broadcast %cst_2 : f32 to vector<8x1xf32>
    %5 = arith.divf %3, %4 : vector<8x1xf32>
    %6 = vector.broadcast %5 : vector<8x1xf32> to vector<8x32xf32>
    %7 = arith.subf %1, %6 : vector<8x32xf32>
    %8 = arith.mulf %7, %7 : vector<8x32xf32>
    %cst_3 = arith.constant dense<0.000000e+00> : vector<8xf32>
    %9 = vector.multi_reduction <add>, %8, %cst_3 [1] : vector<8x32xf32> to vector<8xf32>
    %10 = vector.shape_cast %9 : vector<8xf32> to vector<8x1xf32>
    %cst_4 = arith.constant 3.200000e+01 : f32
    %11 = vector.broadcast %cst_4 : f32 to vector<8x1xf32>
    %12 = arith.divf %10, %11 : vector<8x1xf32>
    %cst_5 = arith.constant 9.99999996E-13 : f32
    %13 = vector.broadcast %cst_5 : f32 to vector<8x1xf32>
    %14 = arith.addf %12, %13 : vector<8x1xf32>
    %15 = math.rsqrt %14 : vector<8x1xf32>
    %c0_6 = arith.constant 0 : index
    %c0_7 = arith.constant 0 : index
    %c0_8 = arith.constant 0 : index
    %16 = vector.load %arg3[%c0_6, %c0_7, %c0_8] : memref<1x1x32xf32, #tpu.memory_space<vmem>>, vector<1x1x32xf32>
    %17 = vector.shape_cast %16 : vector<1x1x32xf32> to vector<1x32xf32>
    %c0_9 = arith.constant 0 : index
    %c0_10 = arith.constant 0 : index
    %c0_11 = arith.constant 0 : index
    %18 = vector.load %arg4[%c0_9, %c0_10, %c0_11] : memref<1x1x32xf32, #tpu.memory_space<vmem>>, vector<1x1x32xf32>
    %19 = vector.shape_cast %18 : vector<1x1x32xf32> to vector<1x32xf32>
    %20 = vector.broadcast %15 : vector<8x1xf32> to vector<8x32xf32>
    %21 = arith.mulf %7, %20 : vector<8x32xf32>
    %22 = vector.broadcast %17 : vector<1x32xf32> to vector<8x32xf32>
    %23 = arith.mulf %21, %22 : vector<8x32xf32>
    %24 = vector.broadcast %19 : vector<1x32xf32> to vector<8x32xf32>
    %25 = arith.addf %23, %24 : vector<8x32xf32>
    %c0_12 = arith.constant 0 : index
    %c0_13 = arith.constant 0 : index
    %c0_14 = arith.constant 0 : index
    %26 = vector.load %arg5[%c0_12, %c0_13, %c0_14] : memref<1x8x32xf32, #tpu.memory_space<vmem>>, vector<1x8x32xf32>
    %27 = vector.shape_cast %26 : vector<1x8x32xf32> to vector<8x32xf32>
    %28 = vector.shape_cast %25 : vector<8x32xf32> to vector<1x8x32xf32>
    tpu.vector_store %arg5[%c0_12, %c0_13, %c0_14], %28 {strides = array<i32>} : memref<1x8x32xf32, #tpu.memory_space<vmem>>, vector<1x8x32xf32>,
    return
  }
  func.func @transform_0(%arg0: i32, %arg1: i32) -> (i32, i32, i32) {
    %c0_i32 = arith.constant 0 : i32
    %c0_i32_0 = arith.constant 0 : i32
    return %arg0, %arg1, %c0_i32 : i32, i32, i32
  }
  func.func @transform_1(%arg0: i32, %arg1: i32) -> (i32, i32, i32) {
    %c0_i32 = arith.constant 0 : i32
    %c0_i32_0 = arith.constant 0 : i32
    %c0_i32_1 = arith.constant 0 : i32
    return %arg0, %c0_i32, %c0_i32_0 : i32, i32, i32
  }
  func.func @transform_2(%arg0: i32, %arg1: i32) -> (i32, i32, i32) {
    %c0_i32 = arith.constant 0 : i32
    %c0_i32_0 = arith.constant 0 : i32
    %c0_i32_1 = arith.constant 0 : i32
    return %arg0, %c0_i32, %c0_i32_0 : i32, i32, i32
  }
  func.func @transform_3(%arg0: i32, %arg1: i32) -> (i32, i32, i32) {
    %c0_i32 = arith.constant 0 : i32
    %c0_i32_0 = arith.constant 0 : i32
    return %arg0, %arg1, %c0_i32 : i32, i32, i32
  }
}

</mosaic_0001>

<bundles_post_ra>
// kernel: tpu_custom_call.1
= control target key start
LH: loop header
LB: loop body
LE: loop exit
PB: predicated region body
PF: predicated region fallthrough
CT: control target
= control target key end

     0   :  { %8 = vsyncpa [#allocation3], 0  ;;  %s834_s0 = inlined_call_operand.hbm [shape: f32[2,8,32], index: 0, kind: input, shape index: {}]   ;;  %s835_s1 = inlined_call_operand.hbm [shape: f32[2,1,32], index: 1, kind: input, shape index: {}]   ;;  %s836_s2 = inlined_call_operand.vmem [shape: f32[2,1,32], index: 2, kind: input, shape index: {}]   ;;  %s837_s3 = inlined_call_operand.hbm [shape: f32[2,8,32], index: 3, kind: output, shape index: {}]  }
   0x1   :  { %10 = vsyncpa [#allocation3 + $0x1], 0 }
   0x2   :  { %11 = vsyncpa [#allocation6], 0 }
   0x3   :  { %13 = vsyncpa [#allocation6 + $0x1], 0 }
   0x4   :  { %14 = vsyncpa [#allocation4], 0 }
   0x5   :  { %16 = vsyncpa [#allocation4 + $0x1], 0  ;;  %s658_s12 = smov 0   ;;  %s660_s13 = smov 0  }
   0x6   :  { %s662_s14 = smov 0   ;;  %s664_s15 = smov 0  }
   0x7   :  { %s666_s16 = smov 0   ;;  %s668_s17 = smov 0  }
   0x8 LB: > { %s408_s18 = sadd.s32 4294967295, %s633_s17   ;;  %s409_s19 = sadd.s32 4294967294, %s633_s17   ;;  %s633_s17 = sphi %s668_s17, %s22_s17   ;;  %s629_s16 = sphi %s666_s16, %s849_s16   ;;  %s625_s15 = sphi %s664_s15, %s848_s15   ;;  %s621_s14 = sphi %s662_s14, %s847_s14   ;;  %s617_s13 = sphi %s660_s13, %s846_s13   ;;  %s613_s12 = sphi %s658_s12, %s845_s12  }
   0x9   : > { %s34_s20 = sadd.s32 1, %s629_s16  ;;  %s43_s21 = sadd.s32 1, %s621_s14 }
   0xa   : > { %p36_p0 = scmp.ge.s32.totalorder %s34_s20, 2  ;;  %p50_p1 = scmp.ne.s32.totalorder %s621_s14, %s617_s13 }
   0xb   : > { %p51_p2 = scmp.eq.s32.totalorder %s633_s17, 0  ;;  %p56_p3 = scmp.ne.s32.totalorder %s617_s13, %s613_s12 }
   0xc   : > { %s851_s20 = smov (%p36_p0, %s34_s20), 0  ;;  %p57_p5 = scmp.eq.s32.totalorder %s408_s18, 0 }
   0xd   : > { %p699_p4 = por %p51_p2, %p50_p1  ;;  %s38_s23 = ssub.s32 %s629_s16, %s851_s20 }
   0xe   : > { %p134_p6 = scmp.eq.s32.totalorder %s408_s18, 1  ;;  %p41_p7 = scmp.eq.s32.totalorder %s38_s23, 0 }
   0xf   : > { %p705_p8 = por %p57_p5, %p56_p3  ;;  %p140_p10 = scmp.eq.s32.totalorder %s409_s19, 1 }
  0x10   : > { %p709_p9 = por %p134_p6, %p50_p1  ;;  %p441_p13 = scmp.lt.s32.totalorder %s633_s17, 2 }
  0x11   : > { %s714_s26 = scalar_select %p41_p7, %s621_s14, %s43_s21  }
  0x12   : > { %p716_p11 = por %p140_p10, %p56_p3  ;;  %s723_s28 = sand.u32 1, %s621_s14  }
  0x13   : > { %s412_s29 = sshll.u32 %s723_s28, 3  ;;  %s413_s30 = sshll.u32 %s629_s16, 7 }
  0x14   : > { %s170_s6 = scalar_lea.hbm %s834_s0, %s413_s30  ;;  %s164_s7 = scalar_lea.vmem [#allocation2], %s412_s29 }
  0x15   : > { %s172_s8 = sshll.u32 %s164_s7, 4  ;;  %p732_p0 = pnand %p441_p13, %p699_p4  ;;  %s173_s8 = int_to_ptr.vmem [resolvable:$true] %s172_s8 }
  0x16   : > { %p415_p1 = scmp.ge.s32.totalorder %s633_s17, 1  ;;  %p200_p2 = scmp.lt.s32.totalorder %s633_s17, 3 }
  0x17   : > { %s161_s10 = scalar_lea.sflag [#allocation3], %s723_s28  ;;  %p495_p3 = pneg %p732_p0 }
  0x18   : > { %s506_s11 = scalar_lea.vmem %s173_s8, 128  ;;  %s635_s18 = smov [#allocation2]  }
  0x19   : > { %p507_p5 = scmp.ne.s32.totalorder %s173_s8, %s506_s11  ;;  %s511_s19 = sshll.u32 %s635_s18, 4  ;;  %s512_s19 = int_to_ptr.vmem [resolvable:$false] %s511_s19 }
  0x1a   : > { %s513_s21 = scalar_lea.vmem %s512_s19, 256  ;;  %p514_p4 = scmp.lt.s32.totalorder %s173_s8, %s512_s19 }
  0x1b   : > { %p509_p6 = pnand %p507_p5, %p495_p3  ;;  %p515_p10 = scmp.lt.s32.totalorder %s513_s21, %s506_s11 }
  0x1d   : > { %p510_p7 = pneg %p509_p6  ;;  %p516_p13 = por %p515_p10, %p514_p4 }
  0x1f   : > { %p517_p12 = pnand %p516_p13, %p510_p7 }
  0x21   : > { %520 = shalt.err (!%p517_p12)
}
  0x22   : > { %433 = dma.hbm_to_vmem [thread:$0]  (!%p732_p0), %s170_s6, 128, %s173_s8, %s161_s10  }
  0x23   : > { %p750_p5 = pnand %p415_p1, %p200_p2  ;;  %s414_s23 = sshll.u32 %s629_s16, 4 }
  0x24   : > { %s182_s29 = scalar_lea.vmem [#allocation5], %s723_s28  ;;  %s187_s7 = scalar_lea.hbm %s835_s1, %s414_s23 }
  0x25   : > { %s189_s30 = sshll.u32 %s182_s29, 4  ;;  %s180_s11 = scalar_lea.sflag [#allocation6], %s723_s28  ;;  %s190_s30 = int_to_ptr.vmem [resolvable:$true] %s189_s30 }
  0x26   : > { %s534_s18 = scalar_lea.vmem %s190_s30, 16  ;;  %s636_s6 = smov [#allocation5]  }
  0x27   : > { %p535_p12 = scmp.ne.s32.totalorder %s190_s30, %s534_s18  ;;  %s539_s8 = sshll.u32 %s636_s6, 4  ;;  %s540_s8 = int_to_ptr.vmem [resolvable:$false] %s539_s8 }
  0x28   : > { %s541_s10 = scalar_lea.vmem %s540_s8, 32  ;;  %p542_p1 = scmp.lt.s32.totalorder %s190_s30, %s540_s8 }
  0x29   : > { %p537_p6 = pnand %p535_p12, %p495_p3  ;;  %p543_p2 = scmp.lt.s32.totalorder %s541_s10, %s534_s18 }
  0x2b   : > { %p538_p7 = pneg %p537_p6  ;;  %p544_p4 = por %p543_p2, %p542_p1 }
  0x2d   : > { %p545_p10 = pnand %p544_p4, %p538_p7 }
  0x2f   : > { %548 = shalt.err (!%p545_p10)
}
  0x30   : > { %436 = dma.hbm_to_vmem [thread:$0]  (!%p732_p0), %s187_s7, 16, %s190_s30, %s180_s11  }
  0x31   : > { %204 = sbr.rel (%p750_p5) target bundleno = 379 (0x17b), region = 32  ;;  %s768_s28 = sand.u32 (!%p750_p5), 1, %s617_s13  }
  0x32   : > { %s416_s19 = sshll.u32 (!%p750_p5), %s768_s28, 3  ;;  %s207_s21 = scalar_lea.sflag (!%p750_p5), [#allocation3], %s768_s28 }
  0x33   : > { %s210_s23 = scalar_lea.vmem (!%p750_p5), [#allocation2], %s416_s19 }
  0x36   : > { %600 = dma.done.wait (%p705_p8), %s207_s21, 128  }
  0x37   : > { %602 = vsyncadd (%p705_p8), %s207_s21, 4294967168  ;;  %s216_s9 = scalar_lea.sflag [#allocation6], %s768_s28  ;;  %s218_s22 = scalar_lea.vmem [#allocation5], %s768_s28 }
  0x38   : > { %604 = dma.done.wait (%p705_p8), %s216_s9, 16  }
  0x39   : > { %606 = vsyncadd (%p705_p8), %s216_s9, 4294967280  ;;  %vm252_vm0 = vcmask 261120   ;;  %v251_v0 = vld [vmem:[%s210_s23] sm:$0xff]  ;;  %p248_p8 = scmp.lt.s32.totalorder %s625_s15, 1  ;;  %s421_s5 = sshll.u32 %s625_s15, 7 }
  0x3a   : > { %v253_v1 = vsel %vm252_vm0, %v251_v0, 0.0  ;;  %v418_v11 = vld [vmem:[%s218_s22] ss:$0 sm:$0xff]  ;;  %s247_s7 = scalar_lea.vmem [#allocation7], %s416_s19  ;;  %s297_s8 = scalar_lea.hbm %s837_s3, %s421_s5 }
  0x3b   : > { %254 = vadd.xlane.f32.xlu0 %v253_v1  ;;  %s249_s24 = scalar_select %p248_p8, %s625_s15, 1 }
  0x3c   : > { %s299_s11 = sshll.u32 %s247_s7, 4  ;;  %s285_s10 = scalar_lea.sflag [#allocation4], %s768_s28  ;;  %s300_s11 = int_to_ptr.vmem [resolvable:$true] %s299_s11 }
  0x3d   : > { %s250_s4 = scalar_lea.vmem %s836_s2, %s249_s24  ;;  %s549_s21 = scalar_lea.vmem %s300_s11, 128 }
  0x3e   : > { %v419_v13 = vld [vmem:[%s250_s4] ss:$0 sm:$0xff]  ;;  %p550_p0 = scmp.ne.s32.totalorder %s300_s11, %s549_s21  ;;  %s637_s23 = smov [#allocation7]  }
  0x3f   : > { %s553_s15 = sshll.u32 %s637_s23, 4  ;;  %s554_s15 = int_to_ptr.vmem [resolvable:$false] %s553_s15 }
  0x40   : > { %p551_p3 = pnand %p550_p0, %p709_p9  ;;  %s555_s19 = scalar_lea.vmem %s554_s15, 256 }
  0x41   : > { %p556_p5 = scmp.lt.s32.totalorder %s300_s11, %s554_s15  ;;  %p557_p12 = scmp.lt.s32.totalorder %s555_s19, %s549_s21 }
  0x42   : > { %p552_p13 = pneg %p551_p3 }
  0x43   : > { %p558_p6 = por %p557_p12, %p556_p5 }
  0x45   : > { %p559_p7 = pnand %p558_p6, %p552_p13 }
  0xc4   : > { %v255_v2 = vpop.xlane.xlu0 %254 }
  0xc5   : > { %v257_v3 = vmul.f32 0.03125, %v255_v2 }
  0xc7   : > { %v258_v4 = vsub.f32 %v251_v0, %v257_v3 }
  0xc9   : > { %v259_v5 = vmul.f32 %v258_v4, %v258_v4 }
  0xcb   : > { %v260_v6 = vsel %vm252_vm0, %v259_v5, 0.0 }
  0xcc   : > { %261 = vadd.xlane.f32.xlu0 %v260_v6 }
 0x155   : > { %v262_v7 = vpop.xlane.xlu0 %261 }
 0x156   : > { %v263_v8 = vmul.f32 0.03125, %v262_v7 }
 0x158   : > { %v264_v9 = vadd.f32 1e-12, %v263_v8 }
 0x15a   : > { %491 = vrsqrt.f32 %v264_v9 }
 0x167   : > { %v492_v10 = vpop.eup %491 }
 0x168   : > { %v268_v12 = vmul.f32 %v492_v10, %v258_v4 }
 0x16a   : > { %v275_v14 = vmul.f32 %v418_v11, %v268_v12 }
 0x16c   : > { %v282_v15 = vadd.f32 %v419_v13, %v275_v14 }
 0x16e   : > { %283 = vst.msk [vmem:[%s247_s7] sm:$0xff] %vm252_vm0, %v282_v15 }
 0x16f   : > { %562 = shalt.err (!%p559_p7)
}
 0x170   : > { %s563_s9 = scalar_lea.hbm %s297_s8, 128  ;;  %s567_s24 = scalar_lea.hbm %s837_s3, 256 }
 0x171   : > { %p564_p1 = scmp.ne.s32.totalorder %s297_s8, %s563_s9  ;;  %p568_p10 = scmp.lt.s32.totalorder %s297_s8, %s837_s3 }
 0x172   : > { %p569_p8 = scmp.lt.s32.totalorder %s567_s24, %s563_s9 }
 0x173   : > { %p565_p2 = pnand %p564_p1, %p709_p9 }
 0x174   : > { %p570_p0 = por %p569_p8, %p568_p10 }
 0x175   : > { %p566_p4 = pneg %p565_p2 }
 0x177   : > { %p571_p3 = pnand %p570_p0, %p566_p4 }
 0x179   : > { %574 = shalt.err (!%p571_p3)
}
 0x17a   : > { %428 = dma.vmem_to_hbm [thread:$0]  (%p709_p9), %s300_s11, 128, %s297_s8, %s285_s10  }
 0x17b PF: > { %s311_s4 = sand.u32 1, %s613_s12   ;;  %p844_p13 = scmp.ge.s32.totalorder %s633_s17, 2 }
 0x17c   : > { %s312_s5 = scalar_lea.sflag [#allocation4], %s311_s4 }
 0x17d   : > { %p438_p5 = pnand %p844_p13, %p716_p11 }
 0x17f   : > { %p439_p12 = pneg %p438_p5 }
 0x181   : > { %608 = dma.done.wait (%p439_p12), %s312_s5, 128  }
 0x182   : > { %610 = vsyncadd (%p439_p12), %s312_s5, 4294967168  ;;  %s22_s17 = sadd.s32 1, %s633_s17   ;;  %s845_s12 = smov %s617_s13 }
 0x183   : > { %p19_p6 = scmp.ge.s32.totalorder %s22_s17, 4   ;;  %s846_s13 = smov %s621_s14 }
 0x184   : > { %s847_s14 = smov %s714_s26  ;;  %s848_s15 = smov %s629_s16 }
 0x185   : > { %s849_s16 = smov %s851_s20  ;;  %21 = sbr.rel (!%p19_p6) target bundleno = 8 (0x8), region = 93 }
 0x18a   :  { %317 = vsyncpa [#allocation3], 1 }
 0x18b   :  { %319 = vsyncpa [#allocation3 + $0x1], 1 }
 0x18c   :  { %320 = vsyncpa [#allocation6], 1 }
 0x18d   :  { %322 = vsyncpa [#allocation6 + $0x1], 1 }
 0x18e   :  { %323 = vsyncpa [#allocation4], 1 }
 0x18f   :  { %325 = vsyncpa [#allocation4 + $0x1], 1 }

</bundles_post_ra>
